<compile_context>
chip_gen: v6e
topology: v6e:2x2x1
jax: 0.10.0
libtpu: 0.0.40
codegen_flags: <defaults>
</compile_context>

<pallas_src>
import functools

import jax
import jax.numpy as jnp
from jax import lax
from jax.experimental import pallas as pl
from jax.experimental.pallas import tpu as pltpu


def _round_up(x, m):
    return ((x + m - 1) // m) * m


def _range_loss_kernel(labels_ref, feat_ref, loss_ref, sums_ref, counts_ref, *,
                       num_classes_padded, margin_inter, beta):
    step = pl.program_id(0)

    @pl.when(step == 0)
    def _():
        sums_ref[...] = jnp.zeros_like(sums_ref)
        counts_ref[...] = jnp.zeros_like(counts_ref)

    lab = labels_ref[...]                                   # (tile_n, 1) int32
    f = feat_ref[...].astype(jnp.float32)                   # (tile_n, D_pad)
    tile_n = f.shape[0]

    # One-hot encode labels in-kernel (VPU compare against a lane iota).
    # Padded tail rows carry label -1 and therefore match no class.
    class_ids = lax.broadcasted_iota(jnp.int32, (tile_n, num_classes_padded), 1)
    onehot = (lab == class_ids).astype(jnp.float32)         # (tile_n, C_pad)

    counts_ref[...] += jnp.sum(onehot, axis=0, keepdims=True)        # (1, C_pad)
    # Per-class feature sums: contract the sample axis on the MXU, f32 acc.
    sums_ref[...] += lax.dot_general(
        onehot, f, dimension_numbers=(((0,), (0,)), ((), ())),
        preferred_element_type=jnp.float32)                          # (C_pad, D_pad)

    @pl.when(step == pl.num_programs(0) - 1)
    def _():
        counts = counts_ref[...]                            # (1, C_pad)
        sums = sums_ref[...]                                # (C_pad, D_pad)
        counts_col = jnp.transpose(counts)                  # (C_pad, 1)
        # EUP reciprocal instead of a divide; clamp so absent classes stay 0.
        inv_col = pl.reciprocal(jnp.maximum(counts_col, 1.0), approx=False)
        centers = sums * inv_col                            # (C_pad, D_pad)

        # Pairwise squared distances between centers (same formula as torch).
        sq = jnp.sum(centers * centers, axis=1, keepdims=True)       # (C_pad, 1)
        gram = lax.dot_general(
            centers, centers, dimension_numbers=(((1,), (1,)), ((), ())),
            preferred_element_type=jnp.float32)             # (C_pad, C_pad), trans_b
        dis = sq + jnp.transpose(sq) - 2.0 * gram

        # Keep only pairs of classes actually present in the batch with a
        # strictly positive distance (mirrors dist_array[dist_array > 0].min()).
        valid_row = (counts > 0.5).astype(jnp.float32)      # (1, C_pad)
        valid_col = (counts_col > 0.5).astype(jnp.float32)  # (C_pad, 1)
        pair_ok = valid_col * valid_row                     # (C_pad, C_pad)
        masked = jnp.where(jnp.logical_and(pair_ok > 0.5, dis > 0.0),
                           dis, jnp.inf)
        d_center = jnp.min(masked)

        l_inter = jnp.maximum(jnp.float32(margin_inter) - d_center,
                              jnp.float32(0.0))
        loss_ref[0, 0] = l_inter * jnp.float32(beta)


def range_loss(features, labels, *, num_classes, margin_inter, beta,
               tile_n=256):
    n, d = features.shape

    # Lane-dense feature blocks: pad D to a multiple of 128 with zero columns
    # (zero columns change neither the centers nor the pairwise distances).
    d_pad = _round_up(d, 128)
    if d_pad != d:
        features = jnp.pad(features, ((0, 0), (0, d_pad - d)))

    # Sublane-aligned class axis; padded classes get zero counts -> masked.
    c_pad = _round_up(max(num_classes, 1), 8)

    # Tile over N; pad the tail with label -1 rows that hit no class.
    tile_n = _round_up(max(8, min(tile_n, _round_up(n, 8))), 8)
    num_tiles = pl.cdiv(n, tile_n)
    n_pad = num_tiles * tile_n
    labels2d = labels.reshape(n, 1).astype(jnp.int32)
    if n_pad != n:
        features = jnp.pad(features, ((0, n_pad - n), (0, 0)))
        labels2d = jnp.pad(labels2d, ((0, n_pad - n), (0, 0)),
                           constant_values=-1)

    kernel = functools.partial(_range_loss_kernel,
                               num_classes_padded=c_pad,
                               margin_inter=float(margin_inter),
                               beta=float(beta))

    feat_bytes = n_pad * d_pad * features.dtype.itemsize
    out = pl.pallas_call(
        kernel,
        out_shape=jax.ShapeDtypeStruct((1, 1), jnp.float32),
        grid=(num_tiles,),
        in_specs=[
            pl.BlockSpec((tile_n, 1), lambda i: (i, 0)),       # labels
            pl.BlockSpec((tile_n, d_pad), lambda i: (i, 0)),   # features
        ],
        out_specs=pl.BlockSpec(memory_space=pltpu.SMEM),       # scalar loss
        scratch_shapes=[
            pltpu.VMEM((c_pad, d_pad), jnp.float32),           # class sums
            pltpu.VMEM((1, c_pad), jnp.float32),               # class counts
        ],
        compiler_params=pltpu.CompilerParams(
            dimension_semantics=("arbitrary",)),               # reduction axis
        cost_estimate=pl.CostEstimate(
            flops=2 * n_pad * c_pad * d_pad + 2 * c_pad * c_pad * d_pad,
            transcendentals=c_pad,
            bytes_accessed=feat_bytes + n_pad * 4 + 4),
    )(labels2d, features)
    return out[0, 0]


def range_loss_ref(features, labels, *, num_classes, margin_inter, beta):
    """Pure-JAX reference (same math as the PyTorch forward)."""
    onehot = jax.nn.one_hot(labels, num_classes, dtype=jnp.float32)
    counts = onehot.sum(0)
    centers = (onehot.T @ features.astype(jnp.float32)) / jnp.maximum(
        counts, 1.0)[:, None]
    sq = jnp.sum(centers * centers, axis=1)
    dis = sq[:, None] + sq[None, :] - 2.0 * centers @ centers.T
    valid = counts > 0
    pair_ok = valid[:, None] & valid[None, :]
    d_center = jnp.min(jnp.where(pair_ok & (dis > 0.0), dis, jnp.inf))
    return jnp.maximum(margin_inter - d_center, 0.0) * beta


if __name__ == "__main__":
    # hyperparameters of RangeLossOp(margin_inter, margin_intra, k, alpha, beta, gpu)
    margin_inter = 50.0
    beta = 0.1
    num_classes = 8

    N, D = 256, 128  # small but exercises a 2-step accumulation grid (tile_n=128)
    key = jax.random.PRNGKey(0)
    features = jax.random.normal(key, (N, D), dtype=jnp.float32)
    labels = jnp.arange(N, dtype=jnp.int32) % num_classes  # all classes present

    loss = range_loss(features, labels, num_classes=num_classes,
                      margin_inter=margin_inter, beta=beta, tile_n=128)
    loss = jax.block_until_ready(loss)

    loss_ref = range_loss_ref(features, labels, num_classes=num_classes,
                              margin_inter=margin_inter, beta=beta)
    assert jnp.allclose(loss, loss_ref, rtol=1e-4, atol=1e-4), (loss, loss_ref)

    print("KERNEL_OK")
</pallas_src>

<mosaic_0001>
module attributes {stable_mosaic.version = 11 : i64} {
  func.func @_range_loss_kernel(%arg0: i32, %arg1: memref<128x1xi32, #tpu.memory_space<vmem>>, %arg2: memref<128x128xf32, #tpu.memory_space<vmem>>, %arg3: memref<1x1xf32, #tpu.memory_space<smem>>, %arg4: memref<8x128xf32, #tpu.memory_space<vmem>>, %arg5: memref<1x8xf32, #tpu.memory_space<vmem>>) attributes {dimension_semantics = [#tpu.dimension_semantics<arbitrary>], iteration_bounds = array<i64: 2>, scalar_prefetch = 0 : i64, scratch_operands = 2 : i64, tpu.core_type = #tpu.core_type<tc>, window_params = [{transform_indices = @transform_0, window_bounds = array<i64: 128, 1>}, {transform_indices = @transform_1, window_bounds = array<i64: 128, 128>}, {transform_indices = @transform_2, window_bounds = array<i64: 1, 1>}]} {
    %c0_i32 = arith.constant 0 : i32
    %0 = arith.cmpi eq, %arg0, %c0_i32 : i32
    %1 = arith.extui %0 : i1 to i32
    %c0_i32_0 = arith.constant 0 : i32
    %2 = arith.cmpi ne, %1, %c0_i32_0 : i32
    scf.if %2 {
      %cst_14 = arith.constant 0.000000e+00 : f32
      %22 = vector.broadcast %cst_14 : f32 to vector<8x128xf32>
      %c0_15 = arith.constant 0 : index
      %c0_16 = arith.constant 0 : index
      %23 = vector.load %arg4[%c0_15, %c0_16] : memref<8x128xf32, #tpu.memory_space<vmem>>, vector<8x128xf32>
      tpu.vector_store %arg4[%c0_15, %c0_16], %22 {strides = array<i32>} : memref<8x128xf32, #tpu.memory_space<vmem>>, vector<8x128xf32>,
      %cst_17 = arith.constant 0.000000e+00 : f32
      %24 = vector.broadcast %cst_17 : f32 to vector<1x8xf32>
      %c0_18 = arith.constant 0 : index
      %c0_19 = arith.constant 0 : index
      %25 = vector.load %arg5[%c0_18, %c0_19] : memref<1x8xf32, #tpu.memory_space<vmem>>, vector<1x8xf32>
      tpu.vector_store %arg5[%c0_18, %c0_19], %24 {strides = array<i32>} : memref<1x8xf32, #tpu.memory_space<vmem>>, vector<1x8xf32>,
    } else {
    }
    %c0 = arith.constant 0 : index
    %c0_1 = arith.constant 0 : index
    %3 = vector.load %arg1[%c0, %c0_1] : memref<128x1xi32, #tpu.memory_space<vmem>>, vector<128x1xi32>
    %c0_2 = arith.constant 0 : index
    %c0_3 = arith.constant 0 : index
    %4 = vector.load %arg2[%c0_2, %c0_3] : memref<128x128xf32, #tpu.memory_space<vmem>>, vector<128x128xf32>
    %5 = tpu.iota {dimensions = array<i32: 1>} : vector<128x8xi32>
    %6 = vector.broadcast %3 : vector<128x1xi32> to vector<128x8xi32>
    %7 = arith.cmpi eq, %6, %5 : vector<128x8xi32>
    %8 = arith.extui %7 : vector<128x8xi1> to vector<128x8xi32>
    %9 = arith.sitofp %8 : vector<128x8xi32> to vector<128x8xf32>
    %c0_4 = arith.constant 0 : index
    %c0_5 = arith.constant 0 : index
    %10 = vector.load %arg5[%c0_4, %c0_5] : memref<1x8xf32, #tpu.memory_space<vmem>>, vector<1x8xf32>
    %cst = arith.constant dense<0.000000e+00> : vector<8xf32>
    %11 = vector.multi_reduction <add>, %9, %cst [0] : vector<128x8xf32> to vector<8xf32>
    %12 = vector.shape_cast %11 : vector<8xf32> to vector<1x8xf32>
    %13 = arith.addf %10, %12 : vector<1x8xf32>
    %c0_6 = arith.constant 0 : index
    %c0_7 = arith.constant 0 : index
    %14 = vector.load %arg5[%c0_6, %c0_7] : memref<1x8xf32, #tpu.memory_space<vmem>>, vector<1x8xf32>
    tpu.vector_store %arg5[%c0_6, %c0_7], %13 {strides = array<i32>} : memref<1x8xf32, #tpu.memory_space<vmem>>, vector<1x8xf32>,
    %c0_8 = arith.constant 0 : index
    %c0_9 = arith.constant 0 : index
    %15 = vector.load %arg4[%c0_8, %c0_9] : memref<8x128xf32, #tpu.memory_space<vmem>>, vector<8x128xf32>
    %cst_10 = arith.constant dense<0.000000e+00> : vector<8x128xf32>
    %16 = tpu.matmul %9, %4, %cst_10 {dimension_numbers = #tpu.dot_dimension_numbers<[0], [0], [1], [1], [0, 1, 1, 1], [], []>} : vector<128x8xf32>, vector<128x128xf32>, vector<8x128xf32> -> vector<8x128xf32>
    %17 = arith.addf %15, %16 : vector<8x128xf32>
    %c0_11 = arith.constant 0 : index
    %c0_12 = arith.constant 0 : index
    %18 = vector.load %arg4[%c0_11, %c0_12] : memref<8x128xf32, #tpu.memory_space<vmem>>, vector<8x128xf32>
    tpu.vector_store %arg4[%c0_11, %c0_12], %17 {strides = array<i32>} : memref<8x128xf32, #tpu.memory_space<vmem>>, vector<8x128xf32>,
    %c1_i32 = arith.constant 1 : i32
    %19 = arith.cmpi eq, %arg0, %c1_i32 : i32
    %20 = arith.extui %19 : i1 to i32
    %c0_i32_13 = arith.constant 0 : i32
    %21 = arith.cmpi ne, %20, %c0_i32_13 : i32
    scf.if %21 {
      %c0_14 = arith.constant 0 : index
      %c0_15 = arith.constant 0 : index
      %22 = vector.load %arg5[%c0_14, %c0_15] : memref<1x8xf32, #tpu.memory_space<vmem>>, vector<1x8xf32>
      %c0_16 = arith.constant 0 : index
      %c0_17 = arith.constant 0 : index
      %23 = vector.load %arg4[%c0_16, %c0_17] : memref<8x128xf32, #tpu.memory_space<vmem>>, vector<8x128xf32>
      %24 = tpu.transpose %22, [1, 0] : vector<1x8xf32> -> vector<8x1xf32>
      %cst_18 = arith.constant 1.000000e+00 : f32
      %25 = vector.broadcast %cst_18 : f32 to vector<8x1xf32>
      %26 = arith.maximumf %24, %25 : vector<8x1xf32>
      %27 = tpu.reciprocal %26 : vector<8x1xf32> -> vector<8x1xf32>
      %28 = vector.broadcast %27 : vector<8x1xf32> to vector<8x128xf32>
      %29 = arith.mulf %23, %28 : vector<8x128xf32>
      %30 = arith.mulf %29, %29 : vector<8x128xf32>
      %cst_19 = arith.constant dense<0.000000e+00> : vector<8xf32>
      %31 = vector.multi_reduction <add>, %30, %cst_19 [1] : vector<8x128xf32> to vector<8xf32>
      %32 = vector.shape_cast %31 : vector<8xf32> to vector<8x1xf32>
      %cst_20 = arith.constant dense<0.000000e+00> : vector<8x8xf32>
      %33 = tpu.matmul %29, %29, %cst_20 {dimension_numbers = #tpu.dot_dimension_numbers<[1], [1], [0], [0], [0, 0, 1, 0], [], []>} : vector<8x128xf32>, vector<8x128xf32>, vector<8x8xf32> -> vector<8x8xf32>
      %34 = tpu.transpose %32, [1, 0] : vector<8x1xf32> -> vector<1x8xf32>
      %35 = vector.broadcast %32 : vector<8x1xf32> to vector<8x8xf32>
      %36 = vector.broadcast %34 : vector<1x8xf32> to vector<8x8xf32>
      %37 = arith.addf %35, %36 : vector<8x8xf32>
      %cst_21 = arith.constant 2.000000e+00 : f32
      %38 = vector.broadcast %cst_21 : f32 to vector<8x8xf32>
      %39 = arith.mulf %38, %33 : vector<8x8xf32>
      %40 = arith.subf %37, %39 : vector<8x8xf32>
      %cst_22 = arith.constant 5.000000e-01 : f32
      %41 = vector.broadcast %cst_22 : f32 to vector<1x8xf32>
      %42 = arith.cmpf ogt, %22, %41 : vector<1x8xf32>
      %43 = arith.extui %42 : vector<1x8xi1> to vector<1x8xi32>
      %44 = arith.sitofp %43 : vector<1x8xi32> to vector<1x8xf32>
      %cst_23 = arith.constant 5.000000e-01 : f32
      %45 = vector.broadcast %cst_23 : f32 to vector<8x1xf32>
      %46 = arith.cmpf ogt, %24, %45 : vector<8x1xf32>
      %47 = arith.extui %46 : vector<8x1xi1> to vector<8x1xi32>
      %48 = arith.sitofp %47 : vector<8x1xi32> to vector<8x1xf32>
      %49 = vector.broadcast %48 : vector<8x1xf32> to vector<8x8xf32>
      %50 = vector.broadcast %44 : vector<1x8xf32> to vector<8x8xf32>
      %51 = arith.mulf %49, %50 : vector<8x8xf32>
      %cst_24 = arith.constant 5.000000e-01 : f32
      %52 = vector.broadcast %cst_24 : f32 to vector<8x8xf32>
      %53 = arith.cmpf ogt, %51, %52 : vector<8x8xf32>
      %cst_25 = arith.constant 0.000000e+00 : f32
      %54 = vector.broadcast %cst_25 : f32 to vector<8x8xf32>
      %55 = arith.cmpf ogt, %40, %54 : vector<8x8xf32>
      %56 = arith.andi %53, %55 : vector<8x8xi1>
      %cst_26 = arith.constant 0x7F800000 : f32
      %57 = vector.broadcast %cst_26 : f32 to vector<8x8xf32>
      %58 = arith.select %56, %40, %57 : vector<8x8xi1>, vector<8x8xf32>
      %59 = vector.shape_cast %58 : vector<8x8xf32> to vector<1x8x8xf32>
      %cst_27 = arith.constant dense<0x7F800000> : vector<1xf32>
      %60 = vector.multi_reduction <minimumf>, %59, %cst_27 [1, 2] : vector<1x8x8xf32> to vector<1xf32>
      %61 = vector.shape_cast %60 : vector<1xf32> to vector<1x1x1xf32>
      %62 = vector.extract %61[0, 0, 0] : f32 from vector<1x1x1xf32>
      %cst_28 = arith.constant 5.000000e+01 : f32
      %63 = arith.subf %cst_28, %62 : f32
      %cst_29 = arith.constant 0.000000e+00 : f32
      %64 = arith.maximumf %63, %cst_29 : f32
      %cst_30 = arith.constant 1.000000e-01 : f32
      %65 = arith.mulf %64, %cst_30 : f32
      %c0_31 = arith.constant 0 : index
      %c0_32 = arith.constant 0 : index
      %66 = memref.load %arg3[%c0_31, %c0_32] : memref<1x1xf32, #tpu.memory_space<smem>>
      memref.store %65, %arg3[%c0_31, %c0_32] : memref<1x1xf32, #tpu.memory_space<smem>>
    } else {
    }
    return
  }
  func.func @transform_0(%arg0: i32) -> (i32, i32) {
    %c0_i32 = arith.constant 0 : i32
    %c0_i32_0 = arith.constant 0 : i32
    return %arg0, %c0_i32 : i32, i32
  }
  func.func @transform_1(%arg0: i32) -> (i32, i32) {
    %c0_i32 = arith.constant 0 : i32
    %c0_i32_0 = arith.constant 0 : i32
    return %arg0, %c0_i32 : i32, i32
  }
  func.func @transform_2(%arg0: i32) -> (i32, i32) {
    %c0_i32 = arith.constant 0 : i32
    %c0_i32_0 = arith.constant 0 : i32
    %c0_i32_1 = arith.constant 0 : i32
    return %c0_i32, %c0_i32_0 : i32, i32
  }
}

</mosaic_0001>

<bundles_post_ra>
// kernel: tpu_custom_call.1
= control target key start
LH: loop header
LB: loop body
LE: loop exit
PB: predicated region body
PF: predicated region fallthrough
CT: control target
= control target key end

     0   :  { %7 = vsyncpa [#allocation5], 0  ;;  %s858_s9 = smov 0   ;;  %s990_s0 = inlined_call_operand.vmem [shape: s32[256,1], index: 0, kind: input, shape index: {}]   ;;  %s991_s1 = inlined_call_operand.vmem [shape: f32[256,128], index: 1, kind: input, shape index: {}]   ;;  %s992_s2 = inlined_call_operand.hbm [shape: f32[1,1], index: 2, kind: output, shape index: {}]  }
   0x1 LB: > { %s864_s10 = sadd.s32 4294967295, %s832_s9   ;;  %p693_p0 = scmp.ge.s32.totalorder %s832_s9, 1  ;;  %s832_s9 = sphi %s858_s9, %s13_s9  }
   0x2   : > { %p120_p1 = scmp.lt.s32.totalorder %s832_s9, 3 }
   0x4   : > { %p121_p2 = pnand %p693_p0, %p120_p1 }
   0x5   : > { %s694_s11 = sshll.u32 (!%p121_p2), %s864_s10, 4  ;;  %p698_p4 = scmp.ne.s32.totalorder (!%p121_p2), %s864_s10, 0 }
   0x6   : > { %124 = sbr.rel (%p121_p2) target bundleno = 1222 (0x4c6), region = 28  ;;  %p143_p3 = scmp.lt.s32.totalorder (!%p121_p2), %s694_s11, 31 }
   0xb   : > { %s994_s11 = smov (!%p143_p3, %s694_s11), 31  ;;  %157 = sbr.rel (%p698_p4) target bundleno = 18 (0x12), region = 32 }
   0xc   : > { %s695_s12 = sshll.u32 %s994_s11, 3 }
   0xd   : > { %s872_s15 = scalar_lea.vmem %s990_s0, %s695_s12  ;;  %s877_s18 = scalar_lea.vmem %s991_s1, %s695_s12 }
  0x10   : > { %vm159_vm0 = vcmask 57344   ;;  %v834_v0 = vmov 0.0  }
  0x11   : > { %158 = vst [vmem:[#allocation2] sm:$0xff] %v834_v0  ;;  %160 = vst.msk [vmem:[#allocation3] sm:$0x1] %vm159_vm0, %v834_v0 }
  0x12 PF: > { %v163_v1 = vld [vmem:[%s872_s15 + $0x10] sm:$0xff]  ;;  %v161_v2 = vld [vmem:[%s872_s15] sm:$0xff]  ;;  %v835_v3 = vmov 0   ;;  %v164_v4 = vld [vmem:[%s872_s15 + $0x18] sm:$0xff]  ;;  %v836_v6 = vmov 0.0   ;;  %vm837_vm1 = vmmov 0   ;;  %v193_v35 = vlaneseq }
  0x13   : > { %807 = vset.pattern.permute.xlu1 %v835_v3  ;;  %806 = vset.pattern.permute.xlu0 %v835_v3  ;;  %v162_v5 = vld [vmem:[%s872_s15 + $0x8] sm:$0xff]  ;;  %v165_v8 = vld [vmem:[%s872_s15 + $0x20] sm:$0xff]  ;;  %v168_v9 = vld [vmem:[%s872_s15 + $0x38] sm:$0xff]  ;;  %vm292_vm4 = vcmask 64512   ;;  %p715_p5 = scmp.ne.s32.totalorder %s864_s10, 1 }
  0x14   : > { %202 = vperm.xlu1 %807, %v163_v1   ;;  %196 = vperm.xlu0 %806, %v161_v2   ;;  %v166_v7 = vld [vmem:[%s872_s15 + $0x28] sm:$0xff]  ;;  %v167_v10 = vld [vmem:[%s872_s15 + $0x30] sm:$0xff]  ;;  %v169_v12 = vld [vmem:[%s872_s15 + $0x40] sm:$0xff]  ;;  %v930_v36 = vand.u32 127, %v193_v35  ;;  %s841_s21 = smov (!%p715_p5), 0.0  }
  0x15   : > { %741 = vmatprep.subr.mxu0 %v836_v6  ;;  %v170_v11 = vld [vmem:[%s872_s15 + $0x48] sm:$0xff]  ;;  %v172_v13 = vld [vmem:[%s872_s15 + $0x58] sm:$0xff]  ;;  %v171_v14 = vld [vmem:[%s872_s15 + $0x50] sm:$0xff]  ;;  %773 = vmatprep.mubr.msk.f32.mxu0 %vm837_vm1, %v836_v6 }
  0x16   : > { %v174_v15 = vld [vmem:[%s872_s15 + $0x68] sm:$0xff]  ;;  %v173_v16 = vld [vmem:[%s872_s15 + $0x60] sm:$0xff]  ;;  %v176_v17 = vld [vmem:[%s872_s15 + $0x78] sm:$0xff] }
  0x17   : > { %v175_v18 = vld [vmem:[%s872_s15 + $0x70] sm:$0xff]  ;;  %v192_v19 = vld [vmem:[%s877_s18 + $0x78] sm:$0xff]  ;;  %v190_v21 = vld [vmem:[%s877_s18 + $0x68] sm:$0xff] }
  0x18   : > { %205 = vperm.xlu1 %807, %v164_v4   ;;  %199 = vperm.xlu0 %806, %v162_v5   ;;  %v191_v20 = vld [vmem:[%s877_s18 + $0x70] sm:$0xff]  ;;  %v189_v22 = vld [vmem:[%s877_s18 + $0x60] sm:$0xff]  ;;  %v188_v23 = vld [vmem:[%s877_s18 + $0x58] sm:$0xff] }
  0x19   : > { %742 = vmatpush3.msra.mxu0 %v192_v19  ;;  %v187_v24 = vld [vmem:[%s877_s18 + $0x50] sm:$0xff]  ;;  %v186_v25 = vld [vmem:[%s877_s18 + $0x48] sm:$0xff]  ;;  %v185_v26 = vld [vmem:[%s877_s18 + $0x40] sm:$0xff] }
  0x1a   : > { %743 = vmatprep.subr.mxu0 %v836_v6  ;;  %v184_v27 = vld [vmem:[%s877_s18 + $0x38] sm:$0xff]  ;;  %v183_v28 = vld [vmem:[%s877_s18 + $0x30] sm:$0xff]  ;;  %v182_v29 = vld [vmem:[%s877_s18 + $0x28] sm:$0xff] }
  0x1b   : > { %744 = vmatpush3.msra.mxu0 %v191_v20  ;;  %v181_v30 = vld [vmem:[%s877_s18 + $0x20] sm:$0xff]  ;;  %v180_v31 = vld [vmem:[%s877_s18 + $0x18] sm:$0xff]  ;;  %v179_v32 = vld [vmem:[%s877_s18 + $0x10] sm:$0xff] }
  0x1c   : > { %211 = vperm.xlu1 %807, %v166_v7   ;;  %208 = vperm.xlu0 %806, %v165_v8   ;;  %v178_v33 = vld [vmem:[%s877_s18 + $0x8] sm:$0xff]  ;;  %v177_v34 = vld [vmem:[%s877_s18] sm:$0xff] }
  0x1d   : > { %745 = vmatprep.subr.mxu0 %v836_v6 }
  0x1e   : > { %746 = vmatpush3.msra.mxu0 %v190_v21 }
  0x1f   : > { %747 = vmatprep.subr.mxu0 %v836_v6 }
  0x20   : > { %217 = vperm.xlu1 %807, %v168_v9   ;;  %214 = vperm.xlu0 %806, %v167_v10  }
  0x21   : > { %748 = vmatpush3.msra.mxu0 %v189_v22 }
  0x22   : > { %749 = vmatprep.subr.mxu0 %v836_v6 }
  0x23   : > { %750 = vmatpush3.msra.mxu0 %v188_v23 }
  0x24   : > { %223 = vperm.xlu1 %807, %v170_v11   ;;  %220 = vperm.xlu0 %806, %v169_v12  }
  0x25   : > { %751 = vmatprep.subr.mxu0 %v836_v6 }
  0x26   : > { %752 = vmatpush3.msra.mxu0 %v187_v24 }
  0x27   : > { %753 = vmatprep.subr.mxu0 %v836_v6 }
  0x28   : > { %229 = vperm.xlu1 %807, %v172_v13   ;;  %226 = vperm.xlu0 %806, %v171_v14  }
  0x29   : > { %754 = vmatpush3.msra.mxu0 %v186_v25 }
  0x2a   : > { %755 = vmatprep.subr.mxu0 %v836_v6 }
  0x2b   : > { %756 = vmatpush3.msra.mxu0 %v185_v26 }
  0x2c   : > { %235 = vperm.xlu1 %807, %v174_v15   ;;  %232 = vperm.xlu0 %806, %v173_v16  }
  0x2d   : > { %757 = vmatprep.subr.mxu0 %v836_v6 }
  0x2e   : > { %758 = vmatpush3.msra.mxu0 %v184_v27 }
  0x2f   : > { %759 = vmatprep.subr.mxu0 %v836_v6 }
  0x30   : > { %241 = vperm.xlu1 %807, %v176_v17   ;;  %238 = vperm.xlu0 %806, %v175_v18  }
  0x31   : > { %760 = vmatpush3.msra.mxu0 %v183_v28 }
  0x32   : > { %761 = vmatprep.subr.mxu0 %v836_v6 }
  0x33   : > { %762 = vmatpush3.msra.mxu0 %v182_v29 }
  0x34   : > { %763 = vmatprep.subr.mxu0 %v836_v6 }
  0x35   : > { %764 = vmatpush3.msra.mxu0 %v181_v30 }
  0x36   : > { %765 = vmatprep.subr.mxu0 %v836_v6 }
  0x37   : > { %766 = vmatpush3.msra.mxu0 %v180_v31 }
  0x38   : > { %767 = vmatprep.subr.mxu0 %v836_v6 }
  0x39   : > { %768 = vmatpush3.msra.mxu0 %v179_v32 }
  0x3a   : > { %769 = vmatprep.subr.mxu0 %v836_v6 }
  0x3b   : > { %770 = vmatpush3.msra.mxu0 %v178_v33 }
  0x3c   : > { %771 = vmatprep.subr.mxu0 %v836_v6 }
  0x3d   : > { %772 = vmatpush3.msra.mxu0 %v177_v34 }
  0x8f   : > { %v203_v37 = vpop.permute.xlu1 %202  ;;  %v197_v38 = vpop.permute.xlu0 %196 }
  0x90   : > { %vm245_vm2 = vcmp.eq.s32.totalorder %v203_v37, %v930_v36  ;;  %vm243_vm3 = vcmp.eq.s32.totalorder %v197_v38, %v930_v36 }
  0x91   : > { %v699_v39 = vsel %vm243_vm3, 1.0, %v836_v6  ;;  %v701_v40 = vsel %vm245_vm2, 1.0, %v836_v6  ;;  %vm331_vm3 = vcmask 57344  }
  0x92   : > { %334 = vxpose.xlu0.b32.start [1/16] (narrow) %v699_v39, 8  ;;  %v296_v45 = vsel %vm292_vm4, %v701_v40, 0.0  ;;  %v293_v46 = vsel %vm292_vm4, %v699_v39, 0.0 }
  0x93   : > { %v206_v41 = vpop.permute.xlu1 %205  ;;  %v200_v42 = vpop.permute.xlu0 %199 }
  0x94   : > { %vm246_vm5 = vcmp.eq.s32.totalorder %v206_v41, %v930_v36  ;;  %vm244_vm6 = vcmp.eq.s32.totalorder %v200_v42, %v930_v36 }
  0x95   : > { %v702_v43 = vsel %vm246_vm5, 1.0, %v836_v6  ;;  %v700_v44 = vsel %vm244_vm6, 1.0, %v836_v6 }
  0x96   : > { %v294_v47 = vsel %vm292_vm4, %v700_v44, 0.0  ;;  %335 = vxpose.xlu0.b32.cont [2/16] (narrow) %v700_v44, 8  ;;  %v298_v51 = vsel %vm292_vm4, %v702_v43, 0.0 }
  0x97   : > { %v295_v48 = vadd.f32 %v294_v47, %v293_v46  ;;  %v212_v49 = vpop.permute.xlu1 %211  ;;  %v209_v50 = vpop.permute.xlu0 %208  ;;  %v333_v46 = vld [vmem:[#allocation2] sm:$0xff] }
  0x98   : > { %vm248_vm7 = vcmp.eq.s32.totalorder %v212_v49, %v930_v36  ;;  %vm247_vm8 = vcmp.eq.s32.totalorder %v209_v50, %v930_v36 }
  0x99   : > { %v297_v52 = vadd.f32 %v296_v45, %v295_v48  ;;  %v703_v53 = vsel %vm247_vm8, 1.0, %v836_v6  ;;  %v704_v54 = vsel %vm248_vm7, 1.0, %v836_v6 }
  0x9a   : > { %336 = vxpose.xlu0.b32.cont [3/16] (narrow) %v701_v40, 8  ;;  %v300_v58 = vsel %vm292_vm4, %v703_v53, 0.0  ;;  %v302_v61 = vsel %vm292_vm4, %v704_v54, 0.0 }
  0x9b   : > { %v299_v55 = vadd.f32 %v298_v51, %v297_v52  ;;  %v218_v56 = vpop.permute.xlu1 %217  ;;  %v215_v57 = vpop.permute.xlu0 %214 }
  0x9c   : > { %vm250_vm9 = vcmp.eq.s32.totalorder %v218_v56, %v930_v36  ;;  %vm249_vm10 = vcmp.eq.s32.totalorder %v215_v57, %v930_v36 }
  0x9d   : > { %v301_v59 = vadd.f32 %v300_v58, %v299_v55  ;;  %v705_v60 = vsel %vm249_vm10, 1.0, %v836_v6  ;;  %v706_v62 = vsel %vm250_vm9, 1.0, %v836_v6 }
  0x9e   : > { %337 = vxpose.xlu0.b32.cont [4/16] (narrow) %v702_v43, 8  ;;  %v304_v2 = vsel %vm292_vm4, %v705_v60, 0.0  ;;  %v306_v5 = vsel %vm292_vm4, %v706_v62, 0.0  ;;  %v291_v43 = vld [vmem:[#allocation3] sm:$0x1] }
  0x9f   : > { %v303_v63 = vadd.f32 %v302_v61, %v301_v59  ;;  %v224_v0 = vpop.permute.xlu1 %223  ;;  %v221_v1 = vpop.permute.xlu0 %220 }
  0xa0   : > { %vm252_vm11 = vcmp.eq.s32.totalorder %v224_v0, %v930_v36  ;;  %vm251_vm12 = vcmp.eq.s32.totalorder %v221_v1, %v930_v36 }
  0xa1   : > { %v305_v3 = vadd.f32 %v304_v2, %v303_v63  ;;  %v707_v4 = vsel %vm251_vm12, 1.0, %v836_v6  ;;  %v708_v7 = vsel %vm252_vm11, 1.0, %v836_v6 }
  0xa2   : > { %338 = vxpose.xlu0.b32.cont [5/16] (narrow) %v703_v53, 8  ;;  %v308_v11 = vsel %vm292_vm4, %v707_v4, 0.0  ;;  %v310_v14 = vsel %vm292_vm4, %v708_v7, 0.0 }
  0xa3   : > { %v307_v8 = vadd.f32 %v306_v5, %v305_v3  ;;  %v230_v9 = vpop.permute.xlu1 %229  ;;  %v227_v10 = vpop.permute.xlu0 %226 }
  0xa4   : > { %vm254_vm13 = vcmp.eq.s32.totalorder %v230_v9, %v930_v36  ;;  %vm253_vm14 = vcmp.eq.s32.totalorder %v227_v10, %v930_v36 }
  0xa5   : > { %v309_v12 = vadd.f32 %v308_v11, %v307_v8  ;;  %v709_v13 = vsel %vm253_vm14, 1.0, %v836_v6  ;;  %v710_v15 = vsel %vm254_vm13, 1.0, %v836_v6 }
  0xa6   : > { %339 = vxpose.xlu0.b32.cont [6/16] (narrow) %v704_v54, 8  ;;  %v312_v19 = vsel %vm292_vm4, %v709_v13, 0.0  ;;  %v314_v22 = vsel %vm292_vm4, %v710_v15, 0.0 }
  0xa7   : > { %v311_v16 = vadd.f32 %v310_v14, %v309_v12  ;;  %v236_v17 = vpop.permute.xlu1 %235  ;;  %v233_v18 = vpop.permute.xlu0 %232 }
  0xa8   : > { %vm256_vm15 = vcmp.eq.s32.totalorder %v236_v17, %v930_v36  ;;  %vm255_vm0 = vcmp.eq.s32.totalorder %v233_v18, %v930_v36 }
  0xa9   : > { %v313_v20 = vadd.f32 %v312_v19, %v311_v16  ;;  %v711_v21 = vsel %vm255_vm0, 1.0, %v836_v6  ;;  %v712_v23 = vsel %vm256_vm15, 1.0, %v836_v6 }
  0xaa   : > { %340 = vxpose.xlu0.b32.cont [7/16] (narrow) %v705_v60, 8  ;;  %v316_v27 = vsel %vm292_vm4, %v711_v21, 0.0  ;;  %v318_v30 = vsel %vm292_vm4, %v712_v23, 0.0 }
  0xab   : > { %v315_v24 = vadd.f32 %v314_v22, %v313_v20  ;;  %v242_v25 = vpop.permute.xlu1 %241  ;;  %v239_v26 = vpop.permute.xlu0 %238 }
  0xac   : > { %vm258_vm1 = vcmp.eq.s32.totalorder %v242_v25, %v930_v36  ;;  %vm257_vm2 = vcmp.eq.s32.totalorder %v239_v26, %v930_v36 }
  0xad   : > { %v317_v28 = vadd.f32 %v316_v27, %v315_v24  ;;  %v713_v29 = vsel %vm257_vm2, 1.0, %v836_v6  ;;  %v714_v31 = vsel %vm258_vm1, 1.0, %v836_v6 }
  0xae   : > { %341 = vxpose.xlu0.b32.cont [8/16] (narrow) %v706_v62, 8  ;;  %v320_v33 = vsel %vm292_vm4, %v713_v29, 0.0  ;;  %v322_v37 = vsel %vm292_vm4, %v714_v31, 0.0 }
  0xaf   : > { %v319_v32 = vadd.f32 %v318_v30, %v317_v28 }
  0xb1   : > { %v321_v34 = vadd.f32 %v320_v33, %v319_v32 }
  0xb2   : > { %342 = vxpose.xlu0.b32.cont [9/16] (narrow) %v707_v4, 8 }
  0xb3   : > { %v323_v38 = vadd.f32 %v322_v37, %v321_v34 }
  0xb5   : > { %v324_v39 = vrot.slane %v323_v38, 4 }
  0xb6   : > { %343 = vxpose.xlu0.b32.cont [10/16] (narrow) %v708_v7, 8 }
  0xb7   : > { %v325_v40 = vadd.f32 %v324_v39, %v323_v38 }
  0xb9   : > { %v326_v36 = vrot.slane %v325_v40, 2 }
  0xba   : > { %344 = vxpose.xlu0.b32.cont [11/16] (narrow) %v709_v13, 8 }
  0xbb   : > { %v327_v41 = vadd.f32 %v326_v36, %v325_v40 }
  0xbd   : > { %v328_v42 = vrot.slane %v327_v41, 1 }
  0xbe   : > { %345 = vxpose.xlu0.b32.cont [12/16] (narrow) %v710_v15, 8 }
  0xbf   : > { %v329_v44 = vadd.f32 %v328_v42, %v327_v41 }
  0xc1   : > { %v330_v6 = vadd.f32 %v329_v44, %v291_v43 }
  0xc2   : > { %346 = vxpose.xlu0.b32.cont [13/16] (narrow) %v711_v21, 8 }
  0xc3   : > { %332 = vst.msk [vmem:[#allocation3] sm:$0x1] %vm331_vm3, %v330_v6 }
  0xc6   : > { %347 = vxpose.xlu0.b32.cont [14/16] (narrow) %v712_v23, 8 }
  0xca   : > { %348 = vxpose.xlu0.b32.cont [15/16] (narrow) %v713_v29, 8 }
  0xce   : > { %349 = vxpose.xlu0.b32.end [16/16] (narrow) %v714_v31, 8 }
 0x10e   : > { %v350_v45 = vpop.trf.xlu0 }
 0x10f   : > { %774 = vmatmul.mubr.f32.vlgmr.msra.gmra.mxu0 %v350_v45 }
 0x1ce   : > { %441 = sbr.rel (%p715_p5) target bundleno = 1216 (0x4c0), region = 36 }
 0x1cf   : > { %v432_v47 = vpop.f32.mrf.mxu0 }
 0x1d0   : > { %v436_v48 = vadd.f32 %v432_v47, %v333_v46 }
 0x1d1   : > { %v775_v49 = vpop.f32.mrf.mxu0 }
 0x1d2   : > { %437 = vst [vmem:[#allocation2] sm:$0xff] %v436_v48 }
 0x1d3   : > { %v442_v50 = vld [vmem:[#allocation3] sm:$0x1]  ;;  %v838_v51 = vmov 0.0   ;;  %v839_v52 = vmov 0   ;;  %vm840_vm5 = vmmov 0   ;;  %v590_v0 = vshrl.u32 %v193_v35, 7 }
 0x1d4   : > { %444 = vxpose.xlu0.b32.start.end [1/1] (short) (narrow) %v442_v50, 8  ;;  %776 = vmatprep.subr.mxu0 %v838_v51  ;;  %vm596_vm7 = vcmp.gt.f32.partialorder %v442_v50, 0.5 }
 0x1d5   : > { %809 = vset.pattern.permute.xlu1 %v839_v52  ;;  %778 = vmatprep.mubr.msk.f32.mxu0 %vm840_vm5, %v838_v51  ;;  %v591_v1 = vsub.s32 0, %v590_v0  ;;  %v716_v2 = vsel %vm596_vm7, 1.0, %v838_v51 }
 0x1d7   : > { %v611_v4 = vrot.slane %v716_v2, %v591_v1 }
 0x1d9   : > { %v443_v56 = vld [vmem:[#allocation2] sm:$0xff] }
 0x1fd   : > { %808 = vset.pattern.permute.xlu0 %v839_v52 }
 0x250   : > { %v460_v53 = vpop.trf.xlu0 }
 0x251   : > { %v476_v54 = vmax.f32 %v460_v53, 1.0  ;;  %vm599_vm6 = vcmp.gt.f32.partialorder %v460_v53, 0.5 }
 0x252   : > { %v717_v60 = vsel %vm599_vm6, 1.0, %v838_v51 }
 0x253   : > { %810 = vrcp.f32 %v476_v54 }
 0x260   : > { %v811_v55 = vpop.eup %810 }
 0x261   : > { %480 = vperm.xlu0 %808, %v811_v55  }
 0x2dc   : > { %v481_v57 = vpop.permute.xlu0 %480 }
 0x2dd   : > { %v483_v58 = vmul.f32 %v481_v57, %v443_v56 }
 0x2df   : > { %777 = vmatpush3.xpose.msra.mxu0 %v483_v58  ;;  %v484_v59 = vmul.f32 %v483_v58, %v483_v58 }
 0x2e1   : > { %485 = vadd.xlane.f32.xlu1 %v484_v59 }
 0x2e2   : > { %779 = vmatmul.mubr.f32.vlgmr.msra.gmra.mxu0 %v483_v58 }
 0x2f2   : > { %604 = vperm.xlu1 %809, %v717_v60  }
 0x36a   : > { %v486_v61 = vpop.xlane.xlu1 %485 }
 0x36b   : > { %557 = vxpose.xlu1.b32.start.end [1/1] (short) (narrow) %v486_v61, 8 }
 0x36e   : > { %v605_v3 = vpop.permute.xlu1 %604 }
 0x36f   : > { %v613_v8 = vmul.f32 %v611_v4, %v605_v3 }
 0x371   : > { %vm614_vm8 = vcmp.gt.f32.partialorder %v613_v8, 0.5 }
 0x3a2   : > { %v553_v62 = vpop.f32.mrf.mxu0 }
 0x3a3   : > { %v594_v9 = vmul.f32 2.0, %v553_v62 }
 0x3a4   : > { %v780_v63 = vpop.f32.mrf.mxu0 }
 0x3e7   : > { %v573_v5 = vpop.trf.xlu1 }
 0x3e8   : > { %v592_v7 = vrot.slane %v573_v5, %v591_v1 }
 0x3ea   : > { %v593_v10 = vadd.f32 %v592_v7, %v486_v61 }
 0x3ec   : > { %v595_v11 = vsub.f32 %v593_v10, %v594_v9 }
 0x3ee   : > { %vm615_vm9 = vcmp.gt.f32.partialorder %v595_v11, 0.0 }
 0x3ef   : > { %vm616_vm10 = vmand %vm614_vm8, %vm615_vm9 }
 0x3f0   : > { %v617_v12 = vsel %vm616_vm10, %v595_v11, inf }
 0x3f1   : > { %v618_v13 = vsel %vm292_vm4, %v617_v12, inf }
 0x3f2   : > { %619 = vmin.xlane.f32.xlu0 %v618_v13 }
 0x47b   : > { %v620_v14 = vpop.xlane.xlu0 %619 }
 0x47c   : > { %v621_v35 = vrot.slane %v620_v14, 4 }
 0x47e   : > { %v622_v15 = vmin.f32 %v620_v14, %v621_v35 }
 0x480   : > { %v623_v16 = vrot.slane %v622_v15, 2 }
 0x482   : > { %v624_v17 = vmin.f32 %v622_v15, %v623_v16 }
 0x484   : > { %v625_v18 = vrot.slane %v624_v17, 1 }
 0x486   : > { %v626_v19 = vmin.f32 %v624_v17, %v625_v18 }
 0x488   : > { %781 = vpush %v626_v19 }
 0x4b9   : > { %s782_s19 = spop %781 }
 0x4ba   : > { %s628_s20 = ssub.f32 50.0, %s782_s19 }
 0x4bc   : > { %s629_s22 = smax.f32 %s841_s21, %s628_s20 }
 0x4bd   : > { %s630_s23 = smul.f32 0.1, %s629_s22 }
 0x4bf   : > { %632 = sst [smem:[#allocation4]] %s630_s23 }
 0x4c0 PF: > { %p787_p6 = scmp.eq.s32.totalorder %s864_s10, 1  ;;  %s842_s24 = smov [#allocation4]  }
 0x4c2   : > { %784 = dma.smem_to_hbm (%p787_p6), %s842_s24, 16, %s992_s2, [#allocation5]  }
 0x4c3   : > { %827 = dma.done.wait (%p787_p6), [#allocation5], 16  }
 0x4c4   : > { %829 = vsyncadd (%p787_p6), [#allocation5], 4294967280 }
 0x4c5   : > { %646 = sfence }
 0x4c6 PF: > { %s13_s9 = sadd.s32 1, %s832_s9  }
 0x4c7   : > { %p10_p7 = scmp.ge.s32.totalorder %s13_s9, 4  }
 0x4c9   :  { %12 = sbr.rel (!%p10_p7) target bundleno = 1 (0x1), region = 67 }
 0x4ce   :  { %652 = vsyncpa [#allocation5], 1 }
 0x4cf   :  { %654 = vsyncpa [#allocation5 + $0x1], 1 }

</bundles_post_ra>
